<compile_context>
chip_gen: v5e
topology: v5e:2x2
jax: 0.10.0
libtpu: 0.0.40
codegen_flags: <defaults>
</compile_context>

<pallas_src>
import jax
import jax.numpy as jnp
from jax.experimental import pallas as pl
from jax.experimental.pallas import tpu as pltpu

_NEG_SLOPE = 0.01  # nn.LeakyReLU default


def _leaky(v):
    return jnp.where(v > 0, v, _NEG_SLOPE * v)


def _varcnn_kernel(x_ref, wsp_ref, bsp_ref, wvar_ref, bvar_ref,
                   wh_ref, bh_ref, mask_ref, out_ref):
    """One grid step = Bt batch samples, batch*time merged on the lane axis.

    x_ref   : (C, L) bf16,  L = Bt * T (lane-dense)
    wsp_ref : (S, C)  bf16  spatial Linear weight
    bsp_ref : (S, 1)  f32
    wvar_ref: (S, 7S) bf16  im2col-flattened k=7 temporal conv weight
    bvar_ref: (S, 1)  f32
    wh_ref  : (2S, 3S) bf16 both 3x3 heads (centre column), im2col-flattened
    bh_ref  : (2S, 1) f32
    mask_ref: (7, L)  f32   validity mask for time shift d = row - 3
    out_ref : (3S, L) f32   rows [0:S]=feat, [S:2S]=inv, [2S:3S]=acs
    """
    l = x_ref.shape[-1]
    x = x_ref[...]                                   # bf16
    masks = mask_ref[...]                            # (7, L) f32 0/1

    # Spatial linear (== transpose -> nn.Linear -> transpose):
    #   h[s, l] = sum_c W_sp[s, c] * x[c, l] + b_sp[s]
    h = jnp.dot(wsp_ref[...], x, preferred_element_type=jnp.float32) + bsp_ref[...]

    def tap_stack(v, ds, mask_row0):
        # im2col: result rows [j*S:(j+1)*S] hold v shifted so column l reads
        # v[:, l + ds[j]] within its own sample, zero outside (== 'same' pad).
        cols = []
        for j, d in enumerate(ds):
            if d == 0:
                cols.append(v)
            else:
                rolled = pltpu.roll(v, shift=(-d) % l, axis=1)       # XLU
                cols.append(rolled * masks[mask_row0 + j:mask_row0 + j + 1, :])
        return jnp.concatenate(cols, axis=0).astype(jnp.bfloat16)

    # Temporal VAR conv (Conv1d k=7, padding='same') + LeakyReLU, one matmul.
    # TODO(synk): VARConv definition not provided; assumed Conv1d(S,S,7,'same').
    h_taps = tap_stack(h, range(-3, 4), 0)                          # (7S, L)
    feat = _leaky(jnp.dot(wvar_ref[...], h_taps,
                          preferred_element_type=jnp.float32) + bvar_ref[...])

    # dist_inv / dist_acs heads: Conv2d(S,S,3,pad=1) on a (S,T,1) input -- only
    # the centre column of each 3x3 kernel sees data, so each head is a k=3
    # 'same' conv along time.  Both heads share the im2col -> one fused matmul.
    f_taps = tap_stack(feat, range(-1, 2), 2)                       # (3S, L)
    heads = _leaky(jnp.dot(wh_ref[...], f_taps,
                           preferred_element_type=jnp.float32) + bh_ref[...])

    out_ref[...] = jnp.concatenate([feat, heads], axis=0).astype(out_ref.dtype)


def pack_params(w_spatial, b_spatial, w_var, b_var, w_inv, b_inv, w_acs, b_acs):
    """One-time repack of torch-layout parameters into kernel-friendly layouts."""
    f32, bf16 = jnp.float32, jnp.bfloat16
    s = w_spatial.shape[0]

    # Conv1d weight (S_out, S_in, 7) -> (S_out, 7*S_in), tap j == offset j-3.
    w_var_flat = jnp.transpose(w_var, (0, 2, 1)).reshape(s, 7 * s)

    # Conv2d weight (S_out, S_in, 3, 3): width-1 input => only centre column
    # w[..., 1] matters.  Flatten to (S_out, 3*S_in), tap j == offset j-1.
    def head_flat(w):
        return jnp.transpose(w[:, :, :, 1], (0, 2, 1)).reshape(s, 3 * s)

    return dict(
        w_sp=w_spatial.astype(bf16),                                   # (S, C)
        b_sp=b_spatial.reshape(s, 1).astype(f32),                      # (S, 1)
        w_var=w_var_flat.astype(bf16),                                 # (S, 7S)
        b_var=b_var.reshape(s, 1).astype(f32),
        w_heads=jnp.concatenate([head_flat(w_inv), head_flat(w_acs)],
                                axis=0).astype(bf16),                  # (2S, 3S)
        b_heads=jnp.concatenate([b_inv, b_acs], axis=0).reshape(2 * s, 1).astype(f32),
    )


def _pick_block_batch(b, t):
    """Per-step batch Bt: divides B, Bt*T is a multiple of 128 (lane-dense and
    (8,128)-legal), lane width <= 1024, and >=2 grid steps remain when possible
    (so v7x's two TensorCores both get work via the parallel grid axis)."""
    best = b  # full-extent block is always legal
    for bt in range(1, b + 1):
        if b % bt:
            continue
        lanes = bt * t
        if lanes % 128 != 0:
            continue
        if lanes > 1024:
            break
        if b // bt < 2:
            break
        best = bt
    return best


@jax.jit
def varcnn_backbone_forward(x, params):
    """x: (B, C_meg, T) float32; params: pack_params(...) output.

    Returns the same nested structure as VARCNNBackbone.forward (eval mode).
    """
    b, c, t = x.shape
    s = params['b_sp'].shape[0]
    bt = _pick_block_batch(b, t)
    nsteps = b // bt
    lanes = bt * t

    # One-time re-layout: channel-first, batch*time merged on the lane axis,
    # cast to bf16 (halves input DMA bytes; MXU-native input dtype).
    x_flat = jnp.transpose(x, (1, 0, 2)).reshape(c, b * t).astype(jnp.bfloat16)

    # Per-shift validity masks (row j <-> shift d = j-3): zero wherever a
    # rolled column would cross a sample boundary (== the conv's zero padding).
    t_idx = jnp.arange(lanes, dtype=jnp.int32) % t
    d_idx = jnp.arange(7, dtype=jnp.int32)[:, None] - 3
    shifted = t_idx[None, :] + d_idx
    masks = ((shifted >= 0) & (shifted < t)).astype(jnp.float32)       # (7, L)

    def whole(arr):  # resident 2-D parameter, same block every step
        return pl.BlockSpec(tuple(arr.shape), lambda i: (0, 0))

    out_slab = pl.pallas_call(
        _varcnn_kernel,
        out_shape=jax.ShapeDtypeStruct((3 * s, b * t), x.dtype),
        grid_spec=pltpu.PrefetchScalarGridSpec(
            num_scalar_prefetch=0,
            grid=(nsteps,),
            in_specs=[
                pl.BlockSpec((c, lanes), lambda i: (0, i)),
                whole(params['w_sp']), whole(params['b_sp']),
                whole(params['w_var']), whole(params['b_var']),
                whole(params['w_heads']), whole(params['b_heads']),
                whole(masks),
            ],
            out_specs=pl.BlockSpec((3 * s, lanes), lambda i: (0, i)),
        ),
        compiler_params=pltpu.CompilerParams(
            dimension_semantics=("parallel",)),
    )(x_flat, params['w_sp'], params['b_sp'], params['w_var'], params['b_var'],
      params['w_heads'], params['b_heads'], masks)

    # Wrapper-side layout plumbing + cheap epilogue (avg / max-pool) on arrays
    # that are returned anyway -- keeps the kernel's output lane-dense.
    slab = jnp.transpose(out_slab.reshape(3 * s, b, t), (1, 0, 2))   # (B, 3S, T)
    feat = slab[:, :s, :]
    inv = slab[:, s:2 * s, :]
    acs = slab[:, 2 * s:, :]

    out = jnp.max(feat.reshape(b, s, t // 2, 2), axis=-1).reshape(b, s * (t // 2))
    out_inv = inv[..., None]                       # (B, S, T, 1)
    out_inv_g = inv.reshape(b, s * t)              # view(out_inv), as in torch code
    out_acs = acs[..., None]                       # (B, S, T, 1)
    out_acs_g = jnp.mean(acs, axis=2)              # view(avg_pool(out_acs)) -> (B, S)
    # TODO(synk): nn.Dropout(p=0.5) is identity here (inference / eval mode).
    return ((feat, out), (out_inv, out_inv_g), (out_acs, out_acs_g))


if __name__ == "__main__":
    B, C, T, S = 8, 16, 32, 8    # batch, MEG channels, time points, source channels

    key = jax.random.PRNGKey(0)
    keys = jax.random.split(key, 9)

    def u(k, shape, fan_in):
        bound = 1.0 / (fan_in ** 0.5)
        return jax.random.uniform(k, shape, jnp.float32, minval=-bound, maxval=bound)

    x = jax.random.normal(keys[0], (B, C, T), jnp.float32)
    w_spatial = u(keys[1], (S, C), C)           # nn.Linear(C, S).weight
    b_spatial = u(keys[2], (S,), C)
    w_var = u(keys[3], (S, S, 7), S * 7)        # Conv1d(S, S, 7).weight
    b_var = u(keys[4], (S,), S * 7)
    w_inv = u(keys[5], (S, S, 3, 3), S * 9)     # Conv2d(S, S, 3).weight
    b_inv = u(keys[6], (S,), S * 9)
    w_acs = u(keys[7], (S, S, 3, 3), S * 9)
    b_acs = u(keys[8], (S,), S * 9)

    params = pack_params(w_spatial, b_spatial, w_var, b_var,
                         w_inv, b_inv, w_acs, b_acs)
    out = varcnn_backbone_forward(x, params)
    out = jax.block_until_ready(out)

    # Pure-JAX reference with identical (eval-mode) semantics, f32 throughout.
    def ref_forward(xx):
        h = jnp.einsum('sc,bct->bst', w_spatial, xx) + b_spatial[None, :, None]
        y = jax.lax.conv_general_dilated(
            h, w_var, window_strides=(1,), padding=((3, 3),),
            dimension_numbers=('NCH', 'OIH', 'NCH')) + b_var[None, :, None]
        feat = jnp.where(y > 0, y, 0.01 * y)
        f4 = feat[..., None]

        def head(w, bb):
            o = jax.lax.conv_general_dilated(
                f4, w, window_strides=(1, 1), padding=((1, 1), (1, 1)),
                dimension_numbers=('NCHW', 'OIHW', 'NCHW')) + bb[None, :, None, None]
            return jnp.where(o > 0, o, 0.01 * o)

        o_inv = head(w_inv, b_inv)
        o_acs = head(w_acs, b_acs)
        pooled = jnp.max(feat.reshape(B, S, T // 2, 2), axis=-1)
        return ((feat, pooled.reshape(B, -1)),
                (o_inv, o_inv.reshape(B, -1)),
                (o_acs, jnp.mean(o_acs, axis=(2, 3))))

    ref = ref_forward(x)
    flat_out, _ = jax.tree_util.tree_flatten(out)
    flat_ref, _ = jax.tree_util.tree_flatten(ref)
    for a, r in zip(flat_out, flat_ref):
        assert a.shape == r.shape, (a.shape, r.shape)
        # bf16 MXU inputs (f32 accumulation) -> allow ~1e-2 numeric slack.
        assert jnp.allclose(a, r, atol=2e-2, rtol=2e-2), float(jnp.max(jnp.abs(a - r)))

    print("KERNEL_OK")
</pallas_src>

<mosaic_0001>
module attributes {stable_mosaic.version = 11 : i64} {
  func.func @_varcnn_kernel(%arg0: i32, %arg1: memref<16x128xbf16, #tpu.memory_space<vmem>>, %arg2: memref<8x16xbf16, #tpu.memory_space<vmem>>, %arg3: memref<8x1xf32, #tpu.memory_space<vmem>>, %arg4: memref<8x56xbf16, #tpu.memory_space<vmem>>, %arg5: memref<8x1xf32, #tpu.memory_space<vmem>>, %arg6: memref<16x24xbf16, #tpu.memory_space<vmem>>, %arg7: memref<16x1xf32, #tpu.memory_space<vmem>>, %arg8: memref<7x128xf32, #tpu.memory_space<vmem>>, %arg9: memref<24x128xf32, #tpu.memory_space<vmem>>) attributes {dimension_semantics = [#tpu.dimension_semantics<parallel>], iteration_bounds = array<i64: 2>, scalar_prefetch = 0 : i64, scratch_operands = 0 : i64, tpu.core_type = #tpu.core_type<tc>, window_params = [{transform_indices = @transform_0, window_bounds = array<i64: 16, 128>}, {pipeline_mode = #tpu.pipeline_mode<synchronous>, transform_indices = @transform_1, window_bounds = array<i64: 8, 16>}, {pipeline_mode = #tpu.pipeline_mode<synchronous>, transform_indices = @transform_2, window_bounds = array<i64: 8, 1>}, {pipeline_mode = #tpu.pipeline_mode<synchronous>, transform_indices = @transform_3, window_bounds = array<i64: 8, 56>}, {pipeline_mode = #tpu.pipeline_mode<synchronous>, transform_indices = @transform_4, window_bounds = array<i64: 8, 1>}, {pipeline_mode = #tpu.pipeline_mode<synchronous>, transform_indices = @transform_5, window_bounds = array<i64: 16, 24>}, {pipeline_mode = #tpu.pipeline_mode<synchronous>, transform_indices = @transform_6, window_bounds = array<i64: 16, 1>}, {pipeline_mode = #tpu.pipeline_mode<synchronous>, transform_indices = @transform_7, window_bounds = array<i64: 7, 128>}, {transform_indices = @transform_8, window_bounds = array<i64: 24, 128>}]} {
    %c0 = arith.constant 0 : index
    %c0_0 = arith.constant 0 : index
    %0 = vector.load %arg1[%c0, %c0_0] : memref<16x128xbf16, #tpu.memory_space<vmem>>, vector<16x128xbf16>
    %c0_1 = arith.constant 0 : index
    %c0_2 = arith.constant 0 : index
    %1 = vector.load %arg8[%c0_1, %c0_2] : memref<7x128xf32, #tpu.memory_space<vmem>>, vector<7x128xf32>
    %c0_3 = arith.constant 0 : index
    %c0_4 = arith.constant 0 : index
    %2 = vector.load %arg2[%c0_3, %c0_4] : memref<8x16xbf16, #tpu.memory_space<vmem>>, vector<8x16xbf16>
    %cst = arith.constant dense<0.000000e+00> : vector<8x128xf32>
    %3 = tpu.matmul %2, %0, %cst {dimension_numbers = #tpu.dot_dimension_numbers<[1], [0], [0], [1], [0, 0, 1, 1], [], []>} : vector<8x16xbf16>, vector<16x128xbf16>, vector<8x128xf32> -> vector<8x128xf32>
    %c0_5 = arith.constant 0 : index
    %c0_6 = arith.constant 0 : index
    %4 = vector.load %arg3[%c0_5, %c0_6] : memref<8x1xf32, #tpu.memory_space<vmem>>, vector<8x1xf32>
    %5 = vector.broadcast %4 : vector<8x1xf32> to vector<8x128xf32>
    %6 = arith.addf %3, %5 : vector<8x128xf32>
    %c3_i32 = arith.constant 3 : i32
    %7 = tpu.dynamic_rotate %6 by %c3_i32 dim 1 : vector<8x128xf32>, i32 -> vector<8x128xf32>
    %8 = vector.extract_strided_slice %1 {offsets = [0, 0], sizes = [1, 128], strides = [1, 1]} : vector<7x128xf32> to vector<1x128xf32>
    %9 = vector.broadcast %8 : vector<1x128xf32> to vector<8x128xf32>
    %10 = arith.mulf %7, %9 : vector<8x128xf32>
    %c2_i32 = arith.constant 2 : i32
    %11 = tpu.dynamic_rotate %6 by %c2_i32 dim 1 : vector<8x128xf32>, i32 -> vector<8x128xf32>
    %12 = vector.extract_strided_slice %1 {offsets = [1, 0], sizes = [1, 128], strides = [1, 1]} : vector<7x128xf32> to vector<1x128xf32>
    %13 = vector.broadcast %12 : vector<1x128xf32> to vector<8x128xf32>
    %14 = arith.mulf %11, %13 : vector<8x128xf32>
    %c1_i32 = arith.constant 1 : i32
    %15 = tpu.dynamic_rotate %6 by %c1_i32 dim 1 : vector<8x128xf32>, i32 -> vector<8x128xf32>
    %16 = vector.extract_strided_slice %1 {offsets = [2, 0], sizes = [1, 128], strides = [1, 1]} : vector<7x128xf32> to vector<1x128xf32>
    %17 = vector.broadcast %16 : vector<1x128xf32> to vector<8x128xf32>
    %18 = arith.mulf %15, %17 : vector<8x128xf32>
    %c127_i32 = arith.constant 127 : i32
    %19 = tpu.dynamic_rotate %6 by %c127_i32 dim 1 : vector<8x128xf32>, i32 -> vector<8x128xf32>
    %20 = vector.extract_strided_slice %1 {offsets = [4, 0], sizes = [1, 128], strides = [1, 1]} : vector<7x128xf32> to vector<1x128xf32>
    %21 = vector.broadcast %20 : vector<1x128xf32> to vector<8x128xf32>
    %22 = arith.mulf %19, %21 : vector<8x128xf32>
    %c126_i32 = arith.constant 126 : i32
    %23 = tpu.dynamic_rotate %6 by %c126_i32 dim 1 : vector<8x128xf32>, i32 -> vector<8x128xf32>
    %24 = vector.extract_strided_slice %1 {offsets = [5, 0], sizes = [1, 128], strides = [1, 1]} : vector<7x128xf32> to vector<1x128xf32>
    %25 = vector.broadcast %24 : vector<1x128xf32> to vector<8x128xf32>
    %26 = arith.mulf %23, %25 : vector<8x128xf32>
    %c125_i32 = arith.constant 125 : i32
    %27 = tpu.dynamic_rotate %6 by %c125_i32 dim 1 : vector<8x128xf32>, i32 -> vector<8x128xf32>
    %28 = vector.extract_strided_slice %1 {offsets = [6, 0], sizes = [1, 128], strides = [1, 1]} : vector<7x128xf32> to vector<1x128xf32>
    %29 = vector.broadcast %28 : vector<1x128xf32> to vector<8x128xf32>
    %30 = arith.mulf %27, %29 : vector<8x128xf32>
    %31 = tpu.concatenate %10, %14, %18, %6, %22, %26, %30 in 0 : vector<8x128xf32>, vector<8x128xf32>, vector<8x128xf32>, vector<8x128xf32>, vector<8x128xf32>, vector<8x128xf32>, vector<8x128xf32> -> vector<56x128xf32>
    %32 = arith.truncf %31 : vector<56x128xf32> to vector<56x128xbf16>
    %c0_7 = arith.constant 0 : index
    %c0_8 = arith.constant 0 : index
    %33 = vector.load %arg4[%c0_7, %c0_8] : memref<8x56xbf16, #tpu.memory_space<vmem>>, vector<8x56xbf16>
    %cst_9 = arith.constant dense<0.000000e+00> : vector<8x128xf32>
    %34 = tpu.matmul %33, %32, %cst_9 {dimension_numbers = #tpu.dot_dimension_numbers<[1], [0], [0], [1], [0, 0, 1, 1], [], []>} : vector<8x56xbf16>, vector<56x128xbf16>, vector<8x128xf32> -> vector<8x128xf32>
    %c0_10 = arith.constant 0 : index
    %c0_11 = arith.constant 0 : index
    %35 = vector.load %arg5[%c0_10, %c0_11] : memref<8x1xf32, #tpu.memory_space<vmem>>, vector<8x1xf32>
    %36 = vector.broadcast %35 : vector<8x1xf32> to vector<8x128xf32>
    %37 = arith.addf %34, %36 : vector<8x128xf32>
    %cst_12 = arith.constant 0.000000e+00 : f32
    %38 = vector.broadcast %cst_12 : f32 to vector<8x128xf32>
    %39 = arith.cmpf ogt, %37, %38 : vector<8x128xf32>
    %cst_13 = arith.constant 0.00999999977 : f32
    %40 = vector.broadcast %cst_13 : f32 to vector<8x128xf32>
    %41 = arith.mulf %40, %37 : vector<8x128xf32>
    %42 = arith.select %39, %37, %41 : vector<8x128xi1>, vector<8x128xf32>
    %c1_i32_14 = arith.constant 1 : i32
    %43 = tpu.dynamic_rotate %42 by %c1_i32_14 dim 1 : vector<8x128xf32>, i32 -> vector<8x128xf32>
    %44 = vector.extract_strided_slice %1 {offsets = [2, 0], sizes = [1, 128], strides = [1, 1]} : vector<7x128xf32> to vector<1x128xf32>
    %45 = vector.broadcast %44 : vector<1x128xf32> to vector<8x128xf32>
    %46 = arith.mulf %43, %45 : vector<8x128xf32>
    %c127_i32_15 = arith.constant 127 : i32
    %47 = tpu.dynamic_rotate %42 by %c127_i32_15 dim 1 : vector<8x128xf32>, i32 -> vector<8x128xf32>
    %48 = vector.extract_strided_slice %1 {offsets = [4, 0], sizes = [1, 128], strides = [1, 1]} : vector<7x128xf32> to vector<1x128xf32>
    %49 = vector.broadcast %48 : vector<1x128xf32> to vector<8x128xf32>
    %50 = arith.mulf %47, %49 : vector<8x128xf32>
    %51 = tpu.concatenate %46, %42, %50 in 0 : vector<8x128xf32>, vector<8x128xf32>, vector<8x128xf32> -> vector<24x128xf32>
    %52 = arith.truncf %51 : vector<24x128xf32> to vector<24x128xbf16>
    %c0_16 = arith.constant 0 : index
    %c0_17 = arith.constant 0 : index
    %53 = vector.load %arg6[%c0_16, %c0_17] : memref<16x24xbf16, #tpu.memory_space<vmem>>, vector<16x24xbf16>
    %cst_18 = arith.constant dense<0.000000e+00> : vector<16x128xf32>
    %54 = tpu.matmul %53, %52, %cst_18 {dimension_numbers = #tpu.dot_dimension_numbers<[1], [0], [0], [1], [0, 0, 1, 1], [], []>} : vector<16x24xbf16>, vector<24x128xbf16>, vector<16x128xf32> -> vector<16x128xf32>
    %c0_19 = arith.constant 0 : index
    %c0_20 = arith.constant 0 : index
    %55 = vector.load %arg7[%c0_19, %c0_20] : memref<16x1xf32, #tpu.memory_space<vmem>>, vector<16x1xf32>
    %56 = vector.broadcast %55 : vector<16x1xf32> to vector<16x128xf32>
    %57 = arith.addf %54, %56 : vector<16x128xf32>
    %cst_21 = arith.constant 0.000000e+00 : f32
    %58 = vector.broadcast %cst_21 : f32 to vector<16x128xf32>
    %59 = arith.cmpf ogt, %57, %58 : vector<16x128xf32>
    %cst_22 = arith.constant 0.00999999977 : f32
    %60 = vector.broadcast %cst_22 : f32 to vector<16x128xf32>
    %61 = arith.mulf %60, %57 : vector<16x128xf32>
    %62 = arith.select %59, %57, %61 : vector<16x128xi1>, vector<16x128xf32>
    %63 = tpu.concatenate %42, %62 in 0 : vector<8x128xf32>, vector<16x128xf32> -> vector<24x128xf32>
    %c0_23 = arith.constant 0 : index
    %c0_24 = arith.constant 0 : index
    %64 = vector.load %arg9[%c0_23, %c0_24] : memref<24x128xf32, #tpu.memory_space<vmem>>, vector<24x128xf32>
    tpu.vector_store %arg9[%c0_23, %c0_24], %63 {strides = array<i32>} : memref<24x128xf32, #tpu.memory_space<vmem>>, vector<24x128xf32>,
    return
  }
  func.func @transform_0(%arg0: i32) -> (i32, i32) {
    %c0_i32 = arith.constant 0 : i32
    %c0_i32_0 = arith.constant 0 : i32
    return %c0_i32, %arg0 : i32, i32
  }
  func.func @transform_1(%arg0: i32) -> (i32, i32) {
    %c0_i32 = arith.constant 0 : i32
    %c0_i32_0 = arith.constant 0 : i32
    %c0_i32_1 = arith.constant 0 : i32
    return %c0_i32, %c0_i32_0 : i32, i32
  }
  func.func @transform_2(%arg0: i32) -> (i32, i32) {
    %c0_i32 = arith.constant 0 : i32
    %c0_i32_0 = arith.constant 0 : i32
    %c0_i32_1 = arith.constant 0 : i32
    return %c0_i32, %c0_i32_0 : i32, i32
  }
  func.func @transform_3(%arg0: i32) -> (i32, i32) {
    %c0_i32 = arith.constant 0 : i32
    %c0_i32_0 = arith.constant 0 : i32
    %c0_i32_1 = arith.constant 0 : i32
    return %c0_i32, %c0_i32_0 : i32, i32
  }
  func.func @transform_4(%arg0: i32) -> (i32, i32) {
    %c0_i32 = arith.constant 0 : i32
    %c0_i32_0 = arith.constant 0 : i32
    %c0_i32_1 = arith.constant 0 : i32
    return %c0_i32, %c0_i32_0 : i32, i32
  }
  func.func @transform_5(%arg0: i32) -> (i32, i32) {
    %c0_i32 = arith.constant 0 : i32
    %c0_i32_0 = arith.constant 0 : i32
    %c0_i32_1 = arith.constant 0 : i32
    return %c0_i32, %c0_i32_0 : i32, i32
  }
  func.func @transform_6(%arg0: i32) -> (i32, i32) {
    %c0_i32 = arith.constant 0 : i32
    %c0_i32_0 = arith.constant 0 : i32
    %c0_i32_1 = arith.constant 0 : i32
    return %c0_i32, %c0_i32_0 : i32, i32
  }
  func.func @transform_7(%arg0: i32) -> (i32, i32) {
    %c0_i32 = arith.constant 0 : i32
    %c0_i32_0 = arith.constant 0 : i32
    %c0_i32_1 = arith.constant 0 : i32
    return %c0_i32, %c0_i32_0 : i32, i32
  }
  func.func @transform_8(%arg0: i32) -> (i32, i32) {
    %c0_i32 = arith.constant 0 : i32
    %c0_i32_0 = arith.constant 0 : i32
    return %c0_i32, %arg0 : i32, i32
  }
}

</mosaic_0001>

<bundles_post_ra>
// kernel: varcnn_backbone_forward.1
= control target key start
LH: loop header
LB: loop body
LE: loop exit
PB: predicated region body
PF: predicated region fallthrough
CT: control target
= control target key end

     0   :  { %s738_s27 = smov 0   ;;  %s740_s28 = smov 0   ;;  %s840_s0 = inlined_call_operand.vmem [shape: bf16[16,256], index: 0, kind: input, shape index: {}]   ;;  %s841_s1 = inlined_call_operand.vmem [shape: bf16[8,16], index: 1, kind: input, shape index: {}]   ;;  %s842_s2 = inlined_call_operand.vmem [shape: f32[8,1], index: 2, kind: input, shape index: {}]   ;;  %s843_s3 = inlined_call_operand.vmem [shape: bf16[8,56], index: 3, kind: input, shape index: {}]   ;;  %s844_s4 = inlined_call_operand.vmem [shape: f32[8,1], index: 4, kind: input, shape index: {}]   ;;  %s845_s5 = inlined_call_operand.vmem [shape: bf16[16,24], index: 5, kind: input, shape index: {}]   ;;  %s846_s6 = inlined_call_operand.vmem [shape: f32[16,1], index: 6, kind: input, shape index: {}]   ;;  %s847_s7 = inlined_call_operand.vmem [shape: f32[7,128], index: 7, kind: input, shape index: {}]   ;;  %s848_s8 = inlined_call_operand.vmem [shape: f32[24,256], index: 8, kind: output, shape index: {}]  }
   0x1   :  { %s742_s29 = smov 0  }
   0x2 LB: > { %s603_s30 = sadd.s32 4294967295, %s684_s29   ;;  %s755_s9 = sadd.s32 1, %s684_s29   ;;  %s684_s29 = sphi %s742_s29, %s852_s29   ;;  %s680_s28 = sphi %s740_s28, %s851_s28   ;;  %s676_s27 = sphi %s738_s27, %s850_s27  }
   0x3   : > { %s22_s10 = ssub.s32 %s684_s29, %s755_s9  ;;  %s25_s11 = sadd.s32 1, %s680_s28 }
   0x4   : > { %p23_p0 = scmp.eq.s32.totalorder %s22_s10, 0  ;;  %p32_p1 = scmp.ne.s32.totalorder %s680_s28, %s676_s27 }
   0x5   : > { %p33_p2 = scmp.eq.s32.totalorder %s684_s29, 0  ;;  %p209_p3 = scmp.eq.s32.totalorder %s603_s30, 1 }
   0x6   : > { %s766_s12 = scalar_select %p23_p0, %s680_s28, %s25_s11  }
   0x7   : > { %p34_p4 = por %p33_p2, %p32_p1  ;;  %p768_p5 = por %p209_p3, %p32_p1 }
   0x8   : > { %p606_p6 = scmp.ge.s32.totalorder %s684_s29, 2 }
   0xa   : > { %252 = sbr.rel (%p606_p6) target bundleno = 21 (0x15), region = 44 }
   0xf   : > { %255 = sbr.rel (!%p34_p4) target bundleno = 21 (0x15), region = 48  ;;  %s257_s14 = sand.u32 (%p34_p4), 1, %s680_s28  }
  0x10   : > { %s608_s15 = sshll.u32 (%p34_p4), %s684_s29, 2  ;;  %s607_s16 = sshll.u32 (%p34_p4), %s257_s14, 3 }
  0x11   : > { %s261_s19 = scalar_lea.vmem (%p34_p4), %s840_s0, %s608_s15  ;;  %s259_s20 = scalar_lea.vmem (%p34_p4), [#allocation2], %s607_s16 }
  0x12   : > { %v278_v0 = vld [vmem:[%s261_s19] sm:$0xf] (%p34_p4)  ;;  %v280_v1 = vld [vmem:[%s261_s19 + $0x8] sm:$0xf] (%p34_p4) }
  0x13   : > { %279 = vst [vmem:[%s259_s20] sm:$0xf] (%p34_p4), %v278_v0 }
  0x14   : > { %281 = vst [vmem:[%s259_s20 + $0x4] sm:$0xf] %v280_v1 }
  0x15 PF: > { %p609_p7 = scmp.ge.s32.totalorder %s684_s29, 1  ;;  %p308_p8 = scmp.lt.s32.totalorder %s684_s29, 3 }
  0x17   : > { %p309_p9 = pnand %p609_p7, %p308_p8 }
  0x18   : > { %s315_s21 = sand.u32 (!%p309_p9), 1, %s676_s27   ;;  %s687_s11 = smov (!%p309_p9), 1  }
  0x19   : > { %312 = sbr.rel (%p309_p9) target bundleno = 709 (0x2c5), region = 89  ;;  %s610_s24 = sshll.u32 (!%p309_p9), %s315_s21, 3 }
  0x1a   : > { %s317_s25 = scalar_lea.vmem (!%p309_p9), [#allocation2], %s610_s24  ;;  %s688_s14 = smov (!%p309_p9), 127  }
  0x1b   : > { %s689_s15 = smov (!%p309_p9), 125   ;;  %s690_s16 = smov (!%p309_p9), 3  }
  0x1c   : > { %s691_s17 = smov (!%p309_p9), 126   ;;  %s692_s18 = smov (!%p309_p9), 2  }
  0x1e   : > { %v352_v2 = vld [vmem:[%s842_s2] sm:$0xff]  ;;  %v686_v3 = vmov 0   ;;  %vm364_vm0 = vcmask 130048   ;;  %vm420_vm1 = vcmask 1043456   ;;  %vm416_vm2 = vcmask 457728   ;;  %v451_v44 = vld [vmem:[%s846_s6 + $0x8] sm:$0xff] }
  0x1f   : > { %659 = vset.pattern.permute.xlu0 %v686_v3  ;;  %660 = vset.pattern.permute.xlu1 %v686_v3  ;;  %v625_v4 = vld [vmem:[%s317_s25] sm:$0xff]  ;;  %vm467_vm4 = vcmask 195584  }
  0x20   : > { %355 = vperm.xlu0 %659, %v352_v2   ;;  %661 = vset.pattern.permute.xlu2 %v686_v3  ;;  %v351_v5 = vld [vmem:[%s841_s1] sm:$0xf] }
  0x21   : > { %375 = vmatpush.bf16.msra.mxu0 %v625_v4  ;;  %v410_v10 = vld [vmem:[%s844_s4] sm:$0xff] }
  0x22   : > { %v350_v11 = vld [vmem:[%s847_s7] sm:$0x7f] }
  0x23   : > { %v403_v12 = vperm.slane %v350_v11, 6  ;;  %v450_v13 = vld [vmem:[%s846_s6] sm:$0xff]  ;;  %v395_v19 = vperm.slane %v350_v11, 4  ;;  %v399_v20 = vperm.slane %v350_v11, 5  ;;  %v391_v22 = vperm.slane %v350_v11, 2 }
  0x24   : > { %615 = vmatmul.msk.bf16.vlgmr.msra.gmra.mxu0 %vm364_vm0, %v351_v5  ;;  %v387_v27 = vperm.slane %v350_v11, 1  ;;  %v383_v30 = vperm.slane %v350_v11, 0  ;;  %v409_v36 = vld [vmem:[%s843_s3] sm:$0xf] }
  0x25   : > { %v626_v51 = vld [vmem:[%s845_s5] sm:$0xff] }
  0x92   : > { %v356_v6 = vpop.permute.xlu0 %355 }
  0xa1   : > { %v377_v7 = vpop.f32.mrf.mxu0 }
  0xa2   : > { %v378_v8 = vadd.f32 %v377_v7, %v356_v6 }
  0xa4   : > { %389 = vrot.lane.b32.xlu2 %v378_v8, %s687_s11  ;;  %393 = vrot.lane.b32.xlu1 %v378_v8, %s688_s14 }
  0xa5   : > { %401 = vrot.lane.b32.xlu0 %v378_v8, %s689_s15  ;;  %s627_s15 = smul.u32 24, %s315_s21 }
  0xa9   : > { %v379_v9 = vpop.f32.mrf.mxu0 }
  0xac   : > { %381 = vrot.lane.b32.xlu2 %v378_v8, %s690_s16  ;;  %397 = vrot.lane.b32.xlu1 %v378_v8, %s691_s17  ;;  %s807_s16 = scalar_lea.vmem [#allocation3], %s627_s15 }
  0xad   : > { %385 = vrot.lane.b32.xlu0 %v378_v8, %s692_s18 }
  0xb4   : > { %413 = vperm.xlu1 %660, %v410_v10  }
  0xbc   : > { %454 = vperm.xlu1 %660, %v450_v13  }
  0xfe   : > { %v390_v17 = vpop.permute.xlu2 %389 }
  0xff   : > { %v392_v26 = vmul.f32 %v391_v22, %v390_v17 }
 0x101   : > { %v406_v33 = vpack.c.bf16 %v378_v8, %v392_v26 }
 0x106   : > { %v382_v31 = vpop.permute.xlu2 %381 }
 0x107   : > { %v384_v34 = vmul.f32 %v383_v30, %v382_v31 }
 0x116   : > { %v394_v14 = vpop.permute.xlu1 %393 }
 0x117   : > { %v402_v15 = vpop.permute.xlu0 %401  ;;  %v396_v24 = vmul.f32 %v395_v19, %v394_v14 }
 0x118   : > { %v404_v16 = vmul.f32 %v403_v12, %v402_v15 }
 0x11a   : > { %v408_v18 = vpack.c.bf16 %v404_v16, %v404_v16 }
 0x11c   : > { %v422_v21 = vsel %vm420_vm1, %v408_v18, 0 }
 0x11d   : > { %428 = vmatpush.bf16.msra.mxu1 %v422_v21 }
 0x11e   : > { %v398_v23 = vpop.permute.xlu1 %397 }
 0x11f   : > { %v400_v25 = vmul.f32 %v399_v20, %v398_v23  ;;  %v386_v29 = vpop.permute.xlu0 %385 }
 0x120   : > { %v388_v32 = vmul.f32 %v387_v27, %v386_v29 }
 0x121   : > { %v407_v28 = vpack.c.bf16 %v400_v25, %v396_v24 }
 0x122   : > { %v405_v35 = vpack.c.bf16 %v388_v32, %v384_v34 }
 0x123   : > { %429 = vmatpush.bf16.msra.mxu1 %v407_v28 }
 0x126   : > { %v414_v37 = vpop.permute.xlu1 %413 }
 0x127   : > { %430 = vmatpush.bf16.msra.mxu1 %v406_v33 }
 0x12b   : > { %431 = vmatpush.bf16.msra.mxu1 %v405_v35 }
 0x12e   : > { %616 = vmatmul.msk.bf16.vlgmr.msra.gmra.mxu1 %vm416_vm2, %v409_v36  ;;  %v455_v52 = vpop.permute.xlu1 %454 }
 0x1ab   : > { %v433_v38 = vpop.f32.mrf.mxu1 }
 0x1ac   : > { %v434_v39 = vadd.f32 %v433_v38, %v414_v37 }
 0x1ae   : > { %vm437_vm3 = vcmp.gt.f32.partialorder %v434_v39, 0.0  ;;  %v438_v40 = vmul.f32 0.01, %v434_v39 }
 0x1b0   : > { %v439_v41 = vsel %vm437_vm3, %v434_v39, %v438_v40 }
 0x1b1   : > { %440 = vrot.lane.b32.xlu0 %v439_v41, %s687_s11  ;;  %494 = vst [vmem:[%s807_s16] sm:$0xff] %v439_v41  ;;  %443 = vrot.lane.b32.xlu2 %v439_v41, %s688_s14  ;;  %s622_s11 = sshll.u32 (%p768_p5), %s603_s30, 3 }
 0x1b2   : > { %s505_s20 = scalar_lea.vmem (%p768_p5), %s848_s8, %s622_s11 }
 0x1b3   : > { %v435_v42 = vpop.f32.mrf.mxu1 }
 0x1b8   : > { %v538_v62 = vld [vmem:[%s807_s16] sm:$0xff] (%p768_p5) }
 0x1b9   : > { %459 = vperm.xlu2 %661, %v451_v44   ;;  %539 = vst [vmem:[%s505_s20] sm:$0xff] (%p768_p5), %v538_v62 }
 0x20b   : > { %v444_v43 = vpop.permute.xlu2 %443 }
 0x20c   : > { %v445_v45 = vmul.f32 %v444_v43, %v395_v19 }
 0x20e   : > { %v447_v46 = vpack.c.bf16 %v445_v45, %v445_v45 }
 0x210   : > { %v472_v47 = vsel %vm420_vm1, %v447_v46, 0 }
 0x211   : > { %480 = vmatpush.bf16.msra.mxu2 %v472_v47 }
 0x213   : > { %v460_v57 = vpop.permute.xlu2 %459 }
 0x223   : > { %v441_v48 = vpop.permute.xlu0 %440 }
 0x224   : > { %v442_v49 = vmul.f32 %v441_v48, %v391_v22 }
 0x226   : > { %v446_v50 = vpack.c.bf16 %v439_v41, %v442_v49 }
 0x228   : > { %481 = vmatpush.bf16.msra.mxu2 %v446_v50 }
 0x22b   : > { %621 = vmatmul.msk.bf16.vlgmr.msra.gmra.mxu2 %vm467_vm4, %v626_v51 }
 0x2ae   : > { %v483_v53 = vpop.f32.mrf.mxu2 }
 0x2af   : > { %v484_v54 = vadd.f32 %v483_v53, %v455_v52 }
 0x2b1   : > { %vm488_vm5 = vcmp.gt.f32.partialorder %v484_v54, 0.0  ;;  %v490_v55 = vmul.f32 0.01, %v484_v54 }
 0x2b3   : > { %v492_v56 = vsel %vm488_vm5, %v484_v54, %v490_v55 }
 0x2b4   : > { %495 = vst [vmem:[%s807_s16 + $0x8] sm:$0xff] %v492_v56 }
 0x2b6   : > { %v485_v58 = vpop.f32.mrf.mxu2 }
 0x2b7   : > { %v486_v59 = vadd.f32 %v485_v58, %v460_v57 }
 0x2b8   : > { %503 = sbr.rel (!%p768_p5) target bundleno = 709 (0x2c5), region = 97 }
 0x2b9   : > { %vm489_vm6 = vcmp.gt.f32.partialorder %v486_v59, 0.0  ;;  %v491_v60 = vmul.f32 0.01, %v486_v59 }
 0x2bb   : > { %v493_v61 = vsel %vm489_vm6, %v486_v59, %v491_v60  ;;  %v540_v63 = vld [vmem:[%s807_s16 + $0x8] sm:$0xff] (%p768_p5) }
 0x2bc   : > { %496 = vst [vmem:[%s807_s16 + $0x10] sm:$0xff] %v493_v61 }
 0x2bd   : > { %541 = vst [vmem:[%s505_s20 + $0x10] sm:$0xff] %v540_v63 }
 0x2c3   : > { %v542_v0 = vld [vmem:[%s807_s16 + $0x10] sm:$0xff] }
 0x2c4   : > { %543 = vst [vmem:[%s505_s20 + $0x20] sm:$0xff] %v542_v0 }
 0x2c5 PF: > { %p15_p10 = scmp.ge.s32.totalorder %s755_s9, 4   ;;  %s850_s27 = smov %s680_s28 }
 0x2c6   : > { %s851_s28 = smov %s766_s12  ;;  %s852_s29 = smov %s755_s9 }
 0x2c7   :  { %17 = sbr.rel (!%p15_p10) target bundleno = 2 (0x2), region = 166 }

</bundles_post_ra>
